<compile_context>
chip_gen: v5e
topology: v5e:2x2
jax: 0.10.0
libtpu: 0.0.40
codegen_flags: <defaults>
</compile_context>

<pallas_src>
import jax
import jax.numpy as jnp
from jax import lax
from jax.experimental import pallas as pl
from jax.experimental.pallas import tpu as pltpu


def _log_sigmoid(x):
    # numerically stable single-exp logsigmoid: min(x, 0) - log1p(exp(-|x|))
    return jnp.minimum(x, 0.0) - jnp.log1p(jnp.exp(-jnp.abs(x)))


def _choose_tm(m, target=256):
    """Largest multiple-of-8 row tile <= target that divides M (else full M)."""
    if m <= target:
        return m
    for t in range(target, 0, -8):
        if m % t == 0:
            return t
    return m


def match_assignment_kernel(d0_ref, d1_ref, wp_ref, bp_ref, wm_ref, bm_ref,
                            sim_ref, core_ref, oa_ref, ob_ref,
                            dcol_ref, drow_ref,
                            md1_s, md0_s, oa_s, ob_row_s,
                            col_max_s, col_sum_s, col_term_s):
    p = pl.program_id(1)      # 0 = stats/cache pass, 1 = finalize pass
    mt = pl.program_id(2)     # m-tile index

    d = wp_ref.shape[0]
    scale = float(d) ** (-0.25)
    bp = bp_ref[...]          # (1, D) f32
    bm = bm_ref[0]            # scalar (SMEM)

    # ---- once per batch: project desc1, matchability row, init column stats
    @pl.when(jnp.logical_and(p == 0, mt == 0))
    def _():
        d1 = d1_ref[0]                                           # (N, D) f32
        md1 = (jnp.dot(d1.astype(jnp.bfloat16), wp_ref[...],
                       preferred_element_type=jnp.float32) + bp) * scale
        md1_s[...] = md1.astype(jnp.bfloat16)
        # z1 directly as a lane-dense (1, N) row: contract D of wm with D of d1.
        z1 = lax.dot_general(wm_ref[...], d1,
                             dimension_numbers=(((0,), (1,)), ((), ())),
                             preferred_element_type=jnp.float32) + bm
        ob = _log_sigmoid(z1)                                    # (1, N)
        ob_row_s[...] = ob
        ob_ref[0] = ob
        drow_ref[0] = ob - z1        # logsigmoid(-z) = logsigmoid(z) - z
        col_max_s[...] = jnp.full(col_max_s.shape, -jnp.inf, col_max_s.dtype)
        col_sum_s[...] = jnp.zeros(col_sum_s.shape, col_sum_s.dtype)

    # ---- pass 0 (per tile): project the desc0 tile once, cache projection +
    #      matchability, write oa / dustbin column, accumulate column stats.
    @pl.when(p == 0)
    def _():
        d0 = d0_ref[0]                                           # (TM, D) f32
        md0 = (jnp.dot(d0.astype(jnp.bfloat16), wp_ref[...],
                       preferred_element_type=jnp.float32) + bp) * scale
        md0_bf = md0.astype(jnp.bfloat16)
        md0_s[mt] = md0_bf                                       # cache for pass 1
        z0 = jnp.dot(d0, wm_ref[...],
                     preferred_element_type=jnp.float32) + bm    # (TM, 1)
        oa = _log_sigmoid(z0)
        oa_s[mt] = oa                                            # cache for core
        oa_ref[0] = oa
        dcol_ref[0] = oa - z0        # logsigmoid(-z0)
        sim = lax.dot_general(md0_bf, md1_s[...],
                              dimension_numbers=(((1,), (1,)), ((), ())),
                              preferred_element_type=jnp.float32)  # (TM, N)
        tile_max = jnp.max(sim, axis=0, keepdims=True)           # (1, N)
        new_max = jnp.maximum(col_max_s[...], tile_max)
        col_sum_s[...] = (col_sum_s[...] * jnp.exp(col_max_s[...] - new_max)
                          + jnp.sum(jnp.exp(sim - new_max), axis=0, keepdims=True))
        col_max_s[...] = new_max

    # ---- pass 1, first tile: finalize the combined column term (ob - LSE_m)
    @pl.when(jnp.logical_and(p == 1, mt == 0))
    def _():
        col_term_s[...] = ob_row_s[...] - (col_max_s[...]
                                           + jnp.log(col_sum_s[...]))

    # ---- pass 1 (per tile): rebuild sim from cached bf16 projections (cheap
    #      MXU; avoids an (M,N) HBM round trip), row LSE, emit sim and core.
    @pl.when(p == 1)
    def _():
        sim = lax.dot_general(md0_s[mt], md1_s[...],
                              dimension_numbers=(((1,), (1,)), ((), ())),
                              preferred_element_type=jnp.float32)  # (TM, N)
        sim_ref[0] = sim
        row_max = jnp.max(sim, axis=1, keepdims=True)            # (TM, 1)
        row_lse = row_max + jnp.log(
            jnp.sum(jnp.exp(sim - row_max), axis=1, keepdims=True))
        # core = log_softmax(sim, n) + log_softmax(sim, m) + oa + ob
        core_ref[0] = (sim + sim) + (oa_s[mt] - row_lse) + col_term_s[...]


def match_assignment(desc0, desc1, wp, bp, wm, bm, *, tm=None):
    """desc0: (B,M,D), desc1: (B,N,D); wp: (D,D)=final_proj.weight^T, bp: (D,),
    wm: (D,1)=matchability.weight^T, bm: (1,). Returns (scores, sim, oa, ob)."""
    b, m, d = desc0.shape
    _, n, _ = desc1.shape

    desc0 = desc0.astype(jnp.float32)
    desc1 = desc1.astype(jnp.float32)
    wp_bf = wp.astype(jnp.bfloat16)               # cast once (MXU takes bf16)
    bp2 = bp.reshape(1, d).astype(jnp.float32)
    wm2 = wm.reshape(d, 1).astype(jnp.float32)
    bm1 = bm.reshape(1).astype(jnp.float32)

    if tm is None:
        tm = _choose_tm(m)
    assert m % tm == 0
    nt = m // tm

    out_shape = (
        jax.ShapeDtypeStruct((b, m, n), jnp.float32),   # sim
        jax.ShapeDtypeStruct((b, m, n), jnp.float32),   # core block of scores
        jax.ShapeDtypeStruct((b, m, 1), jnp.float32),   # oa
        jax.ShapeDtypeStruct((b, 1, n), jnp.float32),   # ob (row layout)
        jax.ShapeDtypeStruct((b, m, 1), jnp.float32),   # dustbin column
        jax.ShapeDtypeStruct((b, 1, n), jnp.float32),   # dustbin row
    )

    grid_spec = pltpu.PrefetchScalarGridSpec(
        num_scalar_prefetch=0,
        grid=(b, 2, nt),
        in_specs=[
            # desc0: walk tiles in pass 0, park on the last tile in pass 1
            # (pass 1 only reads the VMEM cache) -> one HBM read per tile.
            pl.BlockSpec((1, tm, d),
                         lambda bi, p, mt: (bi, (1 - p) * mt + p * (nt - 1), 0)),
            pl.BlockSpec((1, n, d), lambda bi, p, mt: (bi, 0, 0)),     # desc1 (per-batch)
            pl.BlockSpec((d, d), lambda bi, p, mt: (0, 0)),            # wp (bf16)
            pl.BlockSpec((1, d), lambda bi, p, mt: (0, 0)),            # bp
            pl.BlockSpec((d, 1), lambda bi, p, mt: (0, 0)),            # wm
            pl.BlockSpec(memory_space=pltpu.MemorySpace.SMEM),         # bm scalar
        ],
        out_specs=[
            # sim / core are produced in pass 1: pin the block index during
            # pass 0 so the untouched buffer is never flushed, then walk tiles.
            pl.BlockSpec((1, tm, n), lambda bi, p, mt: (bi, p * mt, 0)),  # sim
            pl.BlockSpec((1, tm, n), lambda bi, p, mt: (bi, p * mt, 0)),  # core
            # oa / dustbin column are produced in pass 0: walk tiles there,
            # then park on the last tile during pass 1 (harmless re-flush).
            pl.BlockSpec((1, tm, 1),
                         lambda bi, p, mt: (bi, (1 - p) * mt + p * (nt - 1), 0)),  # oa
            pl.BlockSpec((1, 1, n), lambda bi, p, mt: (bi, 0, 0)),        # ob row
            pl.BlockSpec((1, tm, 1),
                         lambda bi, p, mt: (bi, (1 - p) * mt + p * (nt - 1), 0)),  # dust col
            pl.BlockSpec((1, 1, n), lambda bi, p, mt: (bi, 0, 0)),        # dust row
        ],
        scratch_shapes=[
            pltpu.VMEM((n, d), jnp.bfloat16),        # md1 (projected desc1)
            pltpu.VMEM((nt, tm, d), jnp.bfloat16),   # md0 tile cache
            pltpu.VMEM((nt, tm, 1), jnp.float32),    # oa tile cache
            pltpu.VMEM((1, n), jnp.float32),         # ob row
            pltpu.VMEM((1, n), jnp.float32),         # running column max
            pltpu.VMEM((1, n), jnp.float32),         # running column sum-exp
            pltpu.VMEM((1, n), jnp.float32),         # ob - column LSE
        ],
    )

    sim, core, oa, ob_row, dcol, drow = pl.pallas_call(
        match_assignment_kernel,
        out_shape=out_shape,
        grid_spec=grid_spec,
        compiler_params=pltpu.CompilerParams(
            # batch is independent; pass / m-tile axes carry the VMEM caches
            # and column stats so they stay "arbitrary".
            dimension_semantics=("parallel", "arbitrary", "arbitrary"),
            # above v5e/v6e default scoped limits, under v7x's 64 MiB physical
            vmem_limit_bytes=48 * 1024 * 1024),
    )(desc0, desc1, wp_bf, bp2, wm2, bm1)

    # Assemble the ragged (M+1, N+1) score matrix in XLA (lane-dense kernel outs).
    corner = jnp.zeros((b, 1, 1), jnp.float32)
    top = jnp.concatenate([core, dcol], axis=2)        # (B, M, N+1)
    bottom = jnp.concatenate([drow, corner], axis=2)   # (B, 1, N+1)
    scores = jnp.concatenate([top, bottom], axis=1)    # (B, M+1, N+1)
    ob = jnp.swapaxes(ob_row, 1, 2)                    # (B, N, 1) as in the module
    return scores, sim, oa, ob


def _reference(desc0, desc1, wp, bp, wm, bm):
    """Pure-JAX (f32) reference mirroring the PyTorch module."""
    d = desc0.shape[-1]
    md0 = (desc0 @ wp + bp) / d ** 0.25
    md1 = (desc1 @ wp + bp) / d ** 0.25
    sim = jnp.einsum('bmd,bnd->bmn', md0, md1)
    z0 = desc0 @ wm + bm
    z1 = desc1 @ wm + bm
    oa = jax.nn.log_sigmoid(z0)
    ob = jax.nn.log_sigmoid(z1)
    cert = oa + jnp.swapaxes(ob, 1, 2)
    s0 = jax.nn.log_softmax(sim, axis=2)
    s1 = jax.nn.log_softmax(sim, axis=1)
    b_, m_, n_ = sim.shape
    scores = jnp.zeros((b_, m_ + 1, n_ + 1), sim.dtype)
    scores = scores.at[:, :m_, :n_].set(s0 + s1 + cert)
    scores = scores.at[:, :-1, -1].set(jax.nn.log_sigmoid(-z0[..., 0]))
    scores = scores.at[:, -1, :-1].set(jax.nn.log_sigmoid(-z1[..., 0]))
    return scores, sim, oa, ob


if __name__ == "__main__":
    B, M, N, D = 2, 16, 8, 32

    key = jax.random.PRNGKey(0)
    k0, k1, k2, k3, k4, k5 = jax.random.split(key, 6)

    desc0 = jax.random.normal(k0, (B, M, D), dtype=jnp.float32)
    desc1 = jax.random.normal(k1, (B, N, D), dtype=jnp.float32)

    bound = 1.0 / (D ** 0.5)
    wp = jax.random.uniform(k2, (D, D), jnp.float32, -bound, bound)   # final_proj.weight^T
    bp = jax.random.uniform(k3, (D,), jnp.float32, -bound, bound)     # final_proj.bias
    wm = jax.random.uniform(k4, (D, 1), jnp.float32, -bound, bound)   # matchability.weight^T
    bm = jax.random.uniform(k5, (1,), jnp.float32, -bound, bound)     # matchability.bias

    scores, sim, oa, ob = match_assignment(desc0, desc1, wp, bp, wm, bm)
    jax.block_until_ready((scores, sim, oa, ob))

    # sanity check vs. pure-JAX f32 reference (kernel uses bf16 MXU inputs with
    # f32 accumulation, so the sim/scores comparison is loose; the matchability
    # path stays f32 and is tight).
    r_scores, r_sim, r_oa, r_ob = _reference(desc0, desc1, wp, bp, wm, bm)
    assert scores.shape == r_scores.shape
    assert jnp.allclose(sim, r_sim, atol=5e-2, rtol=5e-2)
    assert jnp.allclose(scores, r_scores, atol=5e-2, rtol=5e-2)
    assert jnp.allclose(oa, r_oa, atol=1e-2, rtol=1e-2)
    assert jnp.allclose(ob, r_ob, atol=1e-2, rtol=1e-2)

    print("KERNEL_OK")
</pallas_src>

<mosaic_0001>
module attributes {stable_mosaic.version = 11 : i64} {
  func.func @match_assignment_kernel(%arg0: i32, %arg1: i32, %arg2: i32, %arg3: memref<1x16x32xf32, #tpu.memory_space<vmem>>, %arg4: memref<1x8x32xf32, #tpu.memory_space<vmem>>, %arg5: memref<32x32xbf16, #tpu.memory_space<vmem>>, %arg6: memref<1x32xf32, #tpu.memory_space<vmem>>, %arg7: memref<32x1xf32, #tpu.memory_space<vmem>>, %arg8: memref<1xf32, #tpu.memory_space<smem>>, %arg9: memref<1x16x8xf32, #tpu.memory_space<vmem>>, %arg10: memref<1x16x8xf32, #tpu.memory_space<vmem>>, %arg11: memref<1x16x1xf32, #tpu.memory_space<vmem>>, %arg12: memref<1x1x8xf32, #tpu.memory_space<vmem>>, %arg13: memref<1x16x1xf32, #tpu.memory_space<vmem>>, %arg14: memref<1x1x8xf32, #tpu.memory_space<vmem>>, %arg15: memref<8x32xbf16, #tpu.memory_space<vmem>>, %arg16: memref<1x16x32xbf16, #tpu.memory_space<vmem>>, %arg17: memref<1x16x1xf32, #tpu.memory_space<vmem>>, %arg18: memref<1x8xf32, #tpu.memory_space<vmem>>, %arg19: memref<1x8xf32, #tpu.memory_space<vmem>>, %arg20: memref<1x8xf32, #tpu.memory_space<vmem>>, %arg21: memref<1x8xf32, #tpu.memory_space<vmem>>) attributes {dimension_semantics = [#tpu.dimension_semantics<parallel>, #tpu.dimension_semantics<arbitrary>, #tpu.dimension_semantics<arbitrary>], iteration_bounds = array<i64: 2, 2, 1>, scalar_prefetch = 0 : i64, scratch_operands = 7 : i64, tpu.core_type = #tpu.core_type<tc>, window_params = [{transform_indices = @transform_0, window_bounds = array<i64: 1, 16, 32>}, {transform_indices = @transform_1, window_bounds = array<i64: 1, 8, 32>}, {pipeline_mode = #tpu.pipeline_mode<synchronous>, transform_indices = @transform_2, window_bounds = array<i64: 32, 32>}, {pipeline_mode = #tpu.pipeline_mode<synchronous>, transform_indices = @transform_3, window_bounds = array<i64: 1, 32>}, {pipeline_mode = #tpu.pipeline_mode<synchronous>, transform_indices = @transform_4, window_bounds = array<i64: 32, 1>}, {transform_indices = @transform_5, window_bounds = array<i64: 1>}, {transform_indices = @transform_6, window_bounds = array<i64: 1, 16, 8>}, {transform_indices = @transform_7, window_bounds = array<i64: 1, 16, 8>}, {transform_indices = @transform_8, window_bounds = array<i64: 1, 16, 1>}, {transform_indices = @transform_9, window_bounds = array<i64: 1, 1, 8>}, {transform_indices = @transform_10, window_bounds = array<i64: 1, 16, 1>}, {transform_indices = @transform_11, window_bounds = array<i64: 1, 1, 8>}]} {
    %c0 = arith.constant 0 : index
    %c0_0 = arith.constant 0 : index
    %0 = vector.load %arg6[%c0, %c0_0] : memref<1x32xf32, #tpu.memory_space<vmem>>, vector<1x32xf32>
    %c0_1 = arith.constant 0 : index
    %1 = memref.load %arg8[%c0_1] : memref<1xf32, #tpu.memory_space<smem>>
    %c0_i32 = arith.constant 0 : i32
    %2 = arith.cmpi eq, %arg1, %c0_i32 : i32
    %c0_i32_2 = arith.constant 0 : i32
    %3 = arith.cmpi eq, %arg2, %c0_i32_2 : i32
    %4 = arith.andi %2, %3 : i1
    %5 = arith.extui %4 : i1 to i32
    %c0_i32_3 = arith.constant 0 : i32
    %6 = arith.cmpi ne, %5, %c0_i32_3 : i32
    scf.if %6 {
      %c0_10 = arith.constant 0 : index
      %c0_11 = arith.constant 0 : index
      %c0_12 = arith.constant 0 : index
      %18 = vector.load %arg4[%c0_10, %c0_11, %c0_12] : memref<1x8x32xf32, #tpu.memory_space<vmem>>, vector<1x8x32xf32>
      %19 = vector.shape_cast %18 : vector<1x8x32xf32> to vector<8x32xf32>
      %20 = arith.truncf %19 : vector<8x32xf32> to vector<8x32xbf16>
      %c0_13 = arith.constant 0 : index
      %c0_14 = arith.constant 0 : index
      %21 = vector.load %arg5[%c0_13, %c0_14] : memref<32x32xbf16, #tpu.memory_space<vmem>>, vector<32x32xbf16>
      %cst = arith.constant dense<0.000000e+00> : vector<8x32xf32>
      %22 = tpu.matmul %20, %21, %cst {dimension_numbers = #tpu.dot_dimension_numbers<[1], [0], [0], [1], [0, 0, 1, 1], [], []>} : vector<8x32xbf16>, vector<32x32xbf16>, vector<8x32xf32> -> vector<8x32xf32>
      %23 = vector.broadcast %0 : vector<1x32xf32> to vector<8x32xf32>
      %24 = arith.addf %22, %23 : vector<8x32xf32>
      %cst_15 = arith.constant 0.420448214 : f32
      %25 = vector.broadcast %cst_15 : f32 to vector<8x32xf32>
      %26 = arith.mulf %24, %25 : vector<8x32xf32>
      %27 = arith.truncf %26 : vector<8x32xf32> to vector<8x32xbf16>
      %c0_16 = arith.constant 0 : index
      %c0_17 = arith.constant 0 : index
      %28 = vector.load %arg15[%c0_16, %c0_17] : memref<8x32xbf16, #tpu.memory_space<vmem>>, vector<8x32xbf16>
      tpu.vector_store %arg15[%c0_16, %c0_17], %27 {strides = array<i32>} : memref<8x32xbf16, #tpu.memory_space<vmem>>, vector<8x32xbf16>,
      %c0_18 = arith.constant 0 : index
      %c0_19 = arith.constant 0 : index
      %29 = vector.load %arg7[%c0_18, %c0_19] : memref<32x1xf32, #tpu.memory_space<vmem>>, vector<32x1xf32>
      %cst_20 = arith.constant dense<0.000000e+00> : vector<1x8xf32>
      %30 = tpu.matmul %29, %19, %cst_20 {dimension_numbers = #tpu.dot_dimension_numbers<[0], [1], [1], [0], [0, 1, 1, 0], [], []>} : vector<32x1xf32>, vector<8x32xf32>, vector<1x8xf32> -> vector<1x8xf32>
      %31 = vector.broadcast %1 : f32 to vector<1x8xf32>
      %32 = arith.addf %30, %31 : vector<1x8xf32>
      %cst_21 = arith.constant 0.000000e+00 : f32
      %33 = vector.broadcast %cst_21 : f32 to vector<1x8xf32>
      %34 = arith.minimumf %32, %33 : vector<1x8xf32>
      %35 = math.absf %32 : vector<1x8xf32>
      %cst_22 = arith.constant 0.000000e+00 : f32
      %36 = vector.broadcast %cst_22 : f32 to vector<1x8xf32>
      %37 = arith.subf %36, %35 : vector<1x8xf32>
      %38 = math.exp %37 : vector<1x8xf32>
      %39 = math.log1p %38 : vector<1x8xf32>
      %40 = arith.subf %34, %39 : vector<1x8xf32>
      %c0_23 = arith.constant 0 : index
      %c0_24 = arith.constant 0 : index
      %41 = vector.load %arg18[%c0_23, %c0_24] : memref<1x8xf32, #tpu.memory_space<vmem>>, vector<1x8xf32>
      tpu.vector_store %arg18[%c0_23, %c0_24], %40 {strides = array<i32>} : memref<1x8xf32, #tpu.memory_space<vmem>>, vector<1x8xf32>,
      %c0_25 = arith.constant 0 : index
      %c0_26 = arith.constant 0 : index
      %c0_27 = arith.constant 0 : index
      %42 = vector.load %arg12[%c0_25, %c0_26, %c0_27] : memref<1x1x8xf32, #tpu.memory_space<vmem>>, vector<1x1x8xf32>
      %43 = vector.shape_cast %42 : vector<1x1x8xf32> to vector<1x8xf32>
      %44 = vector.shape_cast %40 : vector<1x8xf32> to vector<1x1x8xf32>
      tpu.vector_store %arg12[%c0_25, %c0_26, %c0_27], %44 {strides = array<i32>} : memref<1x1x8xf32, #tpu.memory_space<vmem>>, vector<1x1x8xf32>,
      %45 = arith.subf %40, %32 : vector<1x8xf32>
      %c0_28 = arith.constant 0 : index
      %c0_29 = arith.constant 0 : index
      %c0_30 = arith.constant 0 : index
      %46 = vector.load %arg14[%c0_28, %c0_29, %c0_30] : memref<1x1x8xf32, #tpu.memory_space<vmem>>, vector<1x1x8xf32>
      %47 = vector.shape_cast %46 : vector<1x1x8xf32> to vector<1x8xf32>
      %48 = vector.shape_cast %45 : vector<1x8xf32> to vector<1x1x8xf32>
      tpu.vector_store %arg14[%c0_28, %c0_29, %c0_30], %48 {strides = array<i32>} : memref<1x1x8xf32, #tpu.memory_space<vmem>>, vector<1x1x8xf32>,
      %cst_31 = arith.constant 0xFF800000 : f32
      %49 = vector.broadcast %cst_31 : f32 to vector<1x8xf32>
      %c0_32 = arith.constant 0 : index
      %c0_33 = arith.constant 0 : index
      %50 = vector.load %arg19[%c0_32, %c0_33] : memref<1x8xf32, #tpu.memory_space<vmem>>, vector<1x8xf32>
      tpu.vector_store %arg19[%c0_32, %c0_33], %49 {strides = array<i32>} : memref<1x8xf32, #tpu.memory_space<vmem>>, vector<1x8xf32>,
      %cst_34 = arith.constant 0.000000e+00 : f32
      %51 = vector.broadcast %cst_34 : f32 to vector<1x8xf32>
      %c0_35 = arith.constant 0 : index
      %c0_36 = arith.constant 0 : index
      %52 = vector.load %arg20[%c0_35, %c0_36] : memref<1x8xf32, #tpu.memory_space<vmem>>, vector<1x8xf32>
      tpu.vector_store %arg20[%c0_35, %c0_36], %51 {strides = array<i32>} : memref<1x8xf32, #tpu.memory_space<vmem>>, vector<1x8xf32>,
    } else {
    }
    %c0_i32_4 = arith.constant 0 : i32
    %7 = arith.cmpi eq, %arg1, %c0_i32_4 : i32
    %8 = arith.extui %7 : i1 to i32
    %c0_i32_5 = arith.constant 0 : i32
    %9 = arith.cmpi ne, %8, %c0_i32_5 : i32
    scf.if %9 {
      %c0_10 = arith.constant 0 : index
      %c0_11 = arith.constant 0 : index
      %c0_12 = arith.constant 0 : index
      %18 = vector.load %arg3[%c0_10, %c0_11, %c0_12] : memref<1x16x32xf32, #tpu.memory_space<vmem>>, vector<1x16x32xf32>
      %19 = vector.shape_cast %18 : vector<1x16x32xf32> to vector<16x32xf32>
      %20 = arith.truncf %19 : vector<16x32xf32> to vector<16x32xbf16>
      %c0_13 = arith.constant 0 : index
      %c0_14 = arith.constant 0 : index
      %21 = vector.load %arg5[%c0_13, %c0_14] : memref<32x32xbf16, #tpu.memory_space<vmem>>, vector<32x32xbf16>
      %cst = arith.constant dense<0.000000e+00> : vector<16x32xf32>
      %22 = tpu.matmul %20, %21, %cst {dimension_numbers = #tpu.dot_dimension_numbers<[1], [0], [0], [1], [0, 0, 1, 1], [], []>} : vector<16x32xbf16>, vector<32x32xbf16>, vector<16x32xf32> -> vector<16x32xf32>
      %23 = vector.broadcast %0 : vector<1x32xf32> to vector<16x32xf32>
      %24 = arith.addf %22, %23 : vector<16x32xf32>
      %cst_15 = arith.constant 0.420448214 : f32
      %25 = vector.broadcast %cst_15 : f32 to vector<16x32xf32>
      %26 = arith.mulf %24, %25 : vector<16x32xf32>
      %27 = arith.truncf %26 : vector<16x32xf32> to vector<16x32xbf16>
      %28 = arith.index_cast %arg2 : i32 to index
      %c0_16 = arith.constant 0 : index
      %c0_17 = arith.constant 0 : index
      %29 = vector.load %arg16[%28, %c0_16, %c0_17] : memref<1x16x32xbf16, #tpu.memory_space<vmem>>, vector<1x16x32xbf16>
      %30 = vector.shape_cast %29 : vector<1x16x32xbf16> to vector<16x32xbf16>
      %31 = vector.shape_cast %27 : vector<16x32xbf16> to vector<1x16x32xbf16>
      tpu.vector_store %arg16[%28, %c0_16, %c0_17], %31 {strides = array<i32>} : memref<1x16x32xbf16, #tpu.memory_space<vmem>>, vector<1x16x32xbf16>,
      %c0_18 = arith.constant 0 : index
      %c0_19 = arith.constant 0 : index
      %32 = vector.load %arg7[%c0_18, %c0_19] : memref<32x1xf32, #tpu.memory_space<vmem>>, vector<32x1xf32>
      %cst_20 = arith.constant dense<0.000000e+00> : vector<16x1xf32>
      %33 = tpu.matmul %19, %32, %cst_20 {dimension_numbers = #tpu.dot_dimension_numbers<[1], [0], [0], [1], [0, 0, 1, 1], [], []>} : vector<16x32xf32>, vector<32x1xf32>, vector<16x1xf32> -> vector<16x1xf32>
      %34 = vector.broadcast %1 : f32 to vector<16x1xf32>
      %35 = arith.addf %33, %34 : vector<16x1xf32>
      %cst_21 = arith.constant 0.000000e+00 : f32
      %36 = vector.broadcast %cst_21 : f32 to vector<16x1xf32>
      %37 = arith.minimumf %35, %36 : vector<16x1xf32>
      %38 = math.absf %35 : vector<16x1xf32>
      %cst_22 = arith.constant 0.000000e+00 : f32
      %39 = vector.broadcast %cst_22 : f32 to vector<16x1xf32>
      %40 = arith.subf %39, %38 : vector<16x1xf32>
      %41 = math.exp %40 : vector<16x1xf32>
      %42 = math.log1p %41 : vector<16x1xf32>
      %43 = arith.subf %37, %42 : vector<16x1xf32>
      %44 = arith.index_cast %arg2 : i32 to index
      %c0_23 = arith.constant 0 : index
      %c0_24 = arith.constant 0 : index
      %45 = vector.load %arg17[%44, %c0_23, %c0_24] : memref<1x16x1xf32, #tpu.memory_space<vmem>>, vector<1x16x1xf32>
      %46 = vector.shape_cast %45 : vector<1x16x1xf32> to vector<16x1xf32>
      %47 = vector.shape_cast %43 : vector<16x1xf32> to vector<1x16x1xf32>
      tpu.vector_store %arg17[%44, %c0_23, %c0_24], %47 {strides = array<i32>} : memref<1x16x1xf32, #tpu.memory_space<vmem>>, vector<1x16x1xf32>,
      %c0_25 = arith.constant 0 : index
      %c0_26 = arith.constant 0 : index
      %c0_27 = arith.constant 0 : index
      %48 = vector.load %arg11[%c0_25, %c0_26, %c0_27] : memref<1x16x1xf32, #tpu.memory_space<vmem>>, vector<1x16x1xf32>
      %49 = vector.shape_cast %48 : vector<1x16x1xf32> to vector<16x1xf32>
      %50 = vector.shape_cast %43 : vector<16x1xf32> to vector<1x16x1xf32>
      tpu.vector_store %arg11[%c0_25, %c0_26, %c0_27], %50 {strides = array<i32>} : memref<1x16x1xf32, #tpu.memory_space<vmem>>, vector<1x16x1xf32>,
      %51 = arith.subf %43, %35 : vector<16x1xf32>
      %c0_28 = arith.constant 0 : index
      %c0_29 = arith.constant 0 : index
      %c0_30 = arith.constant 0 : index
      %52 = vector.load %arg13[%c0_28, %c0_29, %c0_30] : memref<1x16x1xf32, #tpu.memory_space<vmem>>, vector<1x16x1xf32>
      %53 = vector.shape_cast %52 : vector<1x16x1xf32> to vector<16x1xf32>
      %54 = vector.shape_cast %51 : vector<16x1xf32> to vector<1x16x1xf32>
      tpu.vector_store %arg13[%c0_28, %c0_29, %c0_30], %54 {strides = array<i32>} : memref<1x16x1xf32, #tpu.memory_space<vmem>>, vector<1x16x1xf32>,
      %c0_31 = arith.constant 0 : index
      %c0_32 = arith.constant 0 : index
      %55 = vector.load %arg15[%c0_31, %c0_32] : memref<8x32xbf16, #tpu.memory_space<vmem>>, vector<8x32xbf16>
      %cst_33 = arith.constant dense<0.000000e+00> : vector<16x8xf32>
      %56 = tpu.matmul %27, %55, %cst_33 {dimension_numbers = #tpu.dot_dimension_numbers<[1], [1], [0], [0], [0, 0, 1, 0], [], []>} : vector<16x32xbf16>, vector<8x32xbf16>, vector<16x8xf32> -> vector<16x8xf32>
      %cst_34 = arith.constant dense<0xFF800000> : vector<8xf32>
      %57 = vector.multi_reduction <maximumf>, %56, %cst_34 [0] : vector<16x8xf32> to vector<8xf32>
      %58 = vector.shape_cast %57 : vector<8xf32> to vector<1x8xf32>
      %c0_35 = arith.constant 0 : index
      %c0_36 = arith.constant 0 : index
      %59 = vector.load %arg19[%c0_35, %c0_36] : memref<1x8xf32, #tpu.memory_space<vmem>>, vector<1x8xf32>
      %60 = arith.maximumf %59, %58 : vector<1x8xf32>
      %c0_37 = arith.constant 0 : index
      %c0_38 = arith.constant 0 : index
      %61 = vector.load %arg20[%c0_37, %c0_38] : memref<1x8xf32, #tpu.memory_space<vmem>>, vector<1x8xf32>
      %c0_39 = arith.constant 0 : index
      %c0_40 = arith.constant 0 : index
      %62 = vector.load %arg19[%c0_39, %c0_40] : memref<1x8xf32, #tpu.memory_space<vmem>>, vector<1x8xf32>
      %63 = arith.subf %62, %60 : vector<1x8xf32>
      %64 = math.exp %63 : vector<1x8xf32>
      %65 = arith.mulf %61, %64 : vector<1x8xf32>
      %66 = vector.broadcast %60 : vector<1x8xf32> to vector<16x8xf32>
      %67 = arith.subf %56, %66 : vector<16x8xf32>
      %68 = math.exp %67 : vector<16x8xf32>
      %cst_41 = arith.constant dense<0.000000e+00> : vector<8xf32>
      %69 = vector.multi_reduction <add>, %68, %cst_41 [0] : vector<16x8xf32> to vector<8xf32>
      %70 = vector.shape_cast %69 : vector<8xf32> to vector<1x8xf32>
      %71 = arith.addf %65, %70 : vector<1x8xf32>
      %c0_42 = arith.constant 0 : index
      %c0_43 = arith.constant 0 : index
      %72 = vector.load %arg20[%c0_42, %c0_43] : memref<1x8xf32, #tpu.memory_space<vmem>>, vector<1x8xf32>
      tpu.vector_store %arg20[%c0_42, %c0_43], %71 {strides = array<i32>} : memref<1x8xf32, #tpu.memory_space<vmem>>, vector<1x8xf32>,
      %c0_44 = arith.constant 0 : index
      %c0_45 = arith.constant 0 : index
      %73 = vector.load %arg19[%c0_44, %c0_45] : memref<1x8xf32, #tpu.memory_space<vmem>>, vector<1x8xf32>
      tpu.vector_store %arg19[%c0_44, %c0_45], %60 {strides = array<i32>} : memref<1x8xf32, #tpu.memory_space<vmem>>, vector<1x8xf32>,
    } else {
    }
    %c1_i32 = arith.constant 1 : i32
    %10 = arith.cmpi eq, %arg1, %c1_i32 : i32
    %c0_i32_6 = arith.constant 0 : i32
    %11 = arith.cmpi eq, %arg2, %c0_i32_6 : i32
    %12 = arith.andi %10, %11 : i1
    %13 = arith.extui %12 : i1 to i32
    %c0_i32_7 = arith.constant 0 : i32
    %14 = arith.cmpi ne, %13, %c0_i32_7 : i32
    scf.if %14 {
      %c0_10 = arith.constant 0 : index
      %c0_11 = arith.constant 0 : index
      %18 = vector.load %arg18[%c0_10, %c0_11] : memref<1x8xf32, #tpu.memory_space<vmem>>, vector<1x8xf32>
      %c0_12 = arith.constant 0 : index
      %c0_13 = arith.constant 0 : index
      %19 = vector.load %arg19[%c0_12, %c0_13] : memref<1x8xf32, #tpu.memory_space<vmem>>, vector<1x8xf32>
      %c0_14 = arith.constant 0 : index
      %c0_15 = arith.constant 0 : index
      %20 = vector.load %arg20[%c0_14, %c0_15] : memref<1x8xf32, #tpu.memory_space<vmem>>, vector<1x8xf32>
      %21 = math.log %20 : vector<1x8xf32>
      %22 = arith.addf %19, %21 : vector<1x8xf32>
      %23 = arith.subf %18, %22 : vector<1x8xf32>
      %c0_16 = arith.constant 0 : index
      %c0_17 = arith.constant 0 : index
      %24 = vector.load %arg21[%c0_16, %c0_17] : memref<1x8xf32, #tpu.memory_space<vmem>>, vector<1x8xf32>
      tpu.vector_store %arg21[%c0_16, %c0_17], %23 {strides = array<i32>} : memref<1x8xf32, #tpu.memory_space<vmem>>, vector<1x8xf32>,
    } else {
    }
    %c1_i32_8 = arith.constant 1 : i32
    %15 = arith.cmpi eq, %arg1, %c1_i32_8 : i32
    %16 = arith.extui %15 : i1 to i32
    %c0_i32_9 = arith.constant 0 : i32
    %17 = arith.cmpi ne, %16, %c0_i32_9 : i32
    scf.if %17 {
      %18 = arith.index_cast %arg2 : i32 to index
      %c0_10 = arith.constant 0 : index
      %c0_11 = arith.constant 0 : index
      %19 = vector.load %arg16[%18, %c0_10, %c0_11] : memref<1x16x32xbf16, #tpu.memory_space<vmem>>, vector<1x16x32xbf16>
      %20 = vector.shape_cast %19 : vector<1x16x32xbf16> to vector<16x32xbf16>
      %c0_12 = arith.constant 0 : index
      %c0_13 = arith.constant 0 : index
      %21 = vector.load %arg15[%c0_12, %c0_13] : memref<8x32xbf16, #tpu.memory_space<vmem>>, vector<8x32xbf16>
      %cst = arith.constant dense<0.000000e+00> : vector<16x8xf32>
      %22 = tpu.matmul %20, %21, %cst {dimension_numbers = #tpu.dot_dimension_numbers<[1], [1], [0], [0], [0, 0, 1, 0], [], []>} : vector<16x32xbf16>, vector<8x32xbf16>, vector<16x8xf32> -> vector<16x8xf32>
      %c0_14 = arith.constant 0 : index
      %c0_15 = arith.constant 0 : index
      %c0_16 = arith.constant 0 : index
      %23 = vector.load %arg9[%c0_14, %c0_15, %c0_16] : memref<1x16x8xf32, #tpu.memory_space<vmem>>, vector<1x16x8xf32>
      %24 = vector.shape_cast %23 : vector<1x16x8xf32> to vector<16x8xf32>
      %25 = vector.shape_cast %22 : vector<16x8xf32> to vector<1x16x8xf32>
      tpu.vector_store %arg9[%c0_14, %c0_15, %c0_16], %25 {strides = array<i32>} : memref<1x16x8xf32, #tpu.memory_space<vmem>>, vector<1x16x8xf32>,
      %cst_17 = arith.constant dense<0xFF800000> : vector<16xf32>
      %26 = vector.multi_reduction <maximumf>, %22, %cst_17 [1] : vector<16x8xf32> to vector<16xf32>
      %27 = vector.shape_cast %26 : vector<16xf32> to vector<16x1xf32>
      %28 = vector.broadcast %27 : vector<16x1xf32> to vector<16x8xf32>
      %29 = arith.subf %22, %28 : vector<16x8xf32>
      %30 = math.exp %29 : vector<16x8xf32>
      %cst_18 = arith.constant dense<0.000000e+00> : vector<16xf32>
      %31 = vector.multi_reduction <add>, %30, %cst_18 [1] : vector<16x8xf32> to vector<16xf32>
      %32 = vector.shape_cast %31 : vector<16xf32> to vector<16x1xf32>
      %33 = math.log %32 : vector<16x1xf32>
      %34 = arith.addf %27, %33 : vector<16x1xf32>
      %35 = arith.addf %22, %22 : vector<16x8xf32>
      %36 = arith.index_cast %arg2 : i32 to index
      %c0_19 = arith.constant 0 : index
      %c0_20 = arith.constant 0 : index
      %37 = vector.load %arg17[%36, %c0_19, %c0_20] : memref<1x16x1xf32, #tpu.memory_space<vmem>>, vector<1x16x1xf32>
      %38 = vector.shape_cast %37 : vector<1x16x1xf32> to vector<16x1xf32>
      %39 = arith.subf %38, %34 : vector<16x1xf32>
      %40 = vector.broadcast %39 : vector<16x1xf32> to vector<16x8xf32>
      %41 = arith.addf %35, %40 : vector<16x8xf32>
      %c0_21 = arith.constant 0 : index
      %c0_22 = arith.constant 0 : index
      %42 = vector.load %arg21[%c0_21, %c0_22] : memref<1x8xf32, #tpu.memory_space<vmem>>, vector<1x8xf32>
      %43 = vector.broadcast %42 : vector<1x8xf32> to vector<16x8xf32>
      %44 = arith.addf %41, %43 : vector<16x8xf32>
      %c0_23 = arith.constant 0 : index
      %c0_24 = arith.constant 0 : index
      %c0_25 = arith.constant 0 : index
      %45 = vector.load %arg10[%c0_23, %c0_24, %c0_25] : memref<1x16x8xf32, #tpu.memory_space<vmem>>, vector<1x16x8xf32>
      %46 = vector.shape_cast %45 : vector<1x16x8xf32> to vector<16x8xf32>
      %47 = vector.shape_cast %44 : vector<16x8xf32> to vector<1x16x8xf32>
      tpu.vector_store %arg10[%c0_23, %c0_24, %c0_25], %47 {strides = array<i32>} : memref<1x16x8xf32, #tpu.memory_space<vmem>>, vector<1x16x8xf32>,
    } else {
    }
    return
  }
  func.func @transform_0(%arg0: i32, %arg1: i32, %arg2: i32) -> (i32, i32, i32) {
    %c1_i32 = arith.constant 1 : i32
    %0 = arith.subi %c1_i32, %arg1 : i32
    %1 = arith.muli %0, %arg2 : i32
    %c0_i32 = arith.constant 0 : i32
    %2 = arith.muli %arg1, %c0_i32 : i32
    %3 = arith.addi %1, %2 : i32
    %c0_i32_0 = arith.constant 0 : i32
    %c0_i32_1 = arith.constant 0 : i32
    return %arg0, %3, %c0_i32_0 : i32, i32, i32
  }
  func.func @transform_1(%arg0: i32, %arg1: i32, %arg2: i32) -> (i32, i32, i32) {
    %c0_i32 = arith.constant 0 : i32
    %c0_i32_0 = arith.constant 0 : i32
    %c0_i32_1 = arith.constant 0 : i32
    return %arg0, %c0_i32, %c0_i32_0 : i32, i32, i32
  }
  func.func @transform_2(%arg0: i32, %arg1: i32, %arg2: i32) -> (i32, i32) {
    %c0_i32 = arith.constant 0 : i32
    %c0_i32_0 = arith.constant 0 : i32
    %c0_i32_1 = arith.constant 0 : i32
    return %c0_i32, %c0_i32_0 : i32, i32
  }
  func.func @transform_3(%arg0: i32, %arg1: i32, %arg2: i32) -> (i32, i32) {
    %c0_i32 = arith.constant 0 : i32
    %c0_i32_0 = arith.constant 0 : i32
    %c0_i32_1 = arith.constant 0 : i32
    return %c0_i32, %c0_i32_0 : i32, i32
  }
  func.func @transform_4(%arg0: i32, %arg1: i32, %arg2: i32) -> (i32, i32) {
    %c0_i32 = arith.constant 0 : i32
    %c0_i32_0 = arith.constant 0 : i32
    %c0_i32_1 = arith.constant 0 : i32
    return %c0_i32, %c0_i32_0 : i32, i32
  }
  func.func @transform_5(%arg0: i32, %arg1: i32, %arg2: i32) -> i32 {
    %c0_i32 = arith.constant 0 : i32
    %c0_i32_0 = arith.constant 0 : i32
    return %c0_i32 : i32
  }
  func.func @transform_6(%arg0: i32, %arg1: i32, %arg2: i32) -> (i32, i32, i32) {
    %0 = arith.muli %arg1, %arg2 : i32
    %c0_i32 = arith.constant 0 : i32
    %c0_i32_0 = arith.constant 0 : i32
    return %arg0, %0, %c0_i32 : i32, i32, i32
  }
  func.func @transform_7(%arg0: i32, %arg1: i32, %arg2: i32) -> (i32, i32, i32) {
    %0 = arith.muli %arg1, %arg2 : i32
    %c0_i32 = arith.constant 0 : i32
    %c0_i32_0 = arith.constant 0 : i32
    return %arg0, %0, %c0_i32 : i32, i32, i32
  }
  func.func @transform_8(%arg0: i32, %arg1: i32, %arg2: i32) -> (i32, i32, i32) {
    %c1_i32 = arith.constant 1 : i32
    %0 = arith.subi %c1_i32, %arg1 : i32
    %1 = arith.muli %0, %arg2 : i32
    %c0_i32 = arith.constant 0 : i32
    %2 = arith.muli %arg1, %c0_i32 : i32
    %3 = arith.addi %1, %2 : i32
    %c0_i32_0 = arith.constant 0 : i32
    %c0_i32_1 = arith.constant 0 : i32
    return %arg0, %3, %c0_i32_0 : i32, i32, i32
  }
  func.func @transform_9(%arg0: i32, %arg1: i32, %arg2: i32) -> (i32, i32, i32) {
    %c0_i32 = arith.constant 0 : i32
    %c0_i32_0 = arith.constant 0 : i32
    %c0_i32_1 = arith.constant 0 : i32
    return %arg0, %c0_i32, %c0_i32_0 : i32, i32, i32
  }
  func.func @transform_10(%arg0: i32, %arg1: i32, %arg2: i32) -> (i32, i32, i32) {
    %c1_i32 = arith.constant 1 : i32
    %0 = arith.subi %c1_i32, %arg1 : i32
    %1 = arith.muli %0, %arg2 : i32
    %c0_i32 = arith.constant 0 : i32
    %2 = arith.muli %arg1, %c0_i32 : i32
    %3 = arith.addi %1, %2 : i32
    %c0_i32_0 = arith.constant 0 : i32
    %c0_i32_1 = arith.constant 0 : i32
    return %arg0, %3, %c0_i32_0 : i32, i32, i32
  }
  func.func @transform_11(%arg0: i32, %arg1: i32, %arg2: i32) -> (i32, i32, i32) {
    %c0_i32 = arith.constant 0 : i32
    %c0_i32_0 = arith.constant 0 : i32
    %c0_i32_1 = arith.constant 0 : i32
    return %arg0, %c0_i32, %c0_i32_0 : i32, i32, i32
  }
}

</mosaic_0001>

<bundles_post_ra>
// kernel: tpu_custom_call.1
= control target key start
LH: loop header
LB: loop body
LE: loop exit
PB: predicated region body
PF: predicated region fallthrough
CT: control target
= control target key end

     0   :  { %s2197_s0 = inlined_call_operand.vmem [shape: f32[2,16,32], index: 0, kind: input, shape index: {}]   ;;  %s2198_s1 = inlined_call_operand.hbm [shape: f32[2,8,32], index: 1, kind: input, shape index: {}]   ;;  %s2199_s2 = inlined_call_operand.hbm [shape: bf16[32,32], index: 2, kind: input, shape index: {}]   ;;  %s2200_s3 = inlined_call_operand.vmem [shape: f32[1,32], index: 3, kind: input, shape index: {}]   ;;  %s2201_s4 = inlined_call_operand.vmem [shape: f32[32,1], index: 4, kind: input, shape index: {}]   ;;  %s2202_s5 = inlined_call_operand.<no memory space> [shape: f32[1], index: 5, kind: input, shape index: {}]   ;;  %s2203_s6 = inlined_call_operand.vmem [shape: f32[2,16,8], index: 6, kind: output, shape index: {0}]   ;;  %s2204_s7 = inlined_call_operand.vmem [shape: f32[2,16,8], index: 7, kind: output, shape index: {1}]   ;;  %s2205_s8 = inlined_call_operand.vmem [shape: f32[2,16,1], index: 8, kind: output, shape index: {2}]   ;;  %s2206_s9 = inlined_call_operand.hbm [shape: f32[2,1,8], index: 9, kind: output, shape index: {3}]   ;;  %s2207_s10 = inlined_call_operand.vmem [shape: f32[2,16,1], index: 10, kind: output, shape index: {4}]   ;;  %s2208_s11 = inlined_call_operand.hbm [shape: f32[2,1,8], index: 11, kind: output, shape index: {5}]  }
   0x1   :  { %2217 = sst [smem:[#allocation27_spill]] %s2197_s0 }
   0x2   :  { %2218 = sst [smem:[#allocation28_spill]] %s2198_s1 }
   0x3   :  { %2219 = sst [smem:[#allocation29_spill]] %s2199_s2 }
   0x4   :  { %2220 = sst [smem:[#allocation30_spill]] %s2200_s3 }
   0x5   :  { %2221 = sst [smem:[#allocation31_spill]] %s2201_s4 }
   0x6   :  { %2222 = sst [smem:[#allocation32_spill]] %s2203_s6 }
   0x7   :  { %2223 = sst [smem:[#allocation33_spill]] %s2206_s9 }
   0x8   :  { %2224 = sst [smem:[#allocation34_spill]] %s2207_s10 }
   0x9   :  { %2225 = sst [smem:[#allocation35_spill]] %s2208_s11 }
   0xa   :  { %17 = sst [smem:[#allocation9]] %s2202_s5 }
   0xb   :  { %18 = vsyncpa [#allocation11], 0 }
   0xc   :  { %20 = vsyncpa [#allocation11 + $0x1], 0 }
   0xd   :  { %21 = vsyncpa [#allocation14], 0 }
   0xe   :  { %22 = vsyncpa [#allocation12], 0 }
   0xf   :  { %24 = vsyncpa [#allocation12 + $0x1], 0 }
  0x10   :  { %25 = vsyncpa [#allocation17], 0 }
  0x11   :  { %27 = vsyncpa [#allocation17 + $0x1], 0  ;;  %s1908_s19 = smov 0   ;;  %s1910_s20 = smov 0  }
  0x12   :  { %s1912_s21 = smov 0   ;;  %s1914_s22 = smov 0  }
  0x13   :  { %s1916_s23 = smov 0   ;;  %s1918_s24 = smov 0  }
  0x14   :  { %s1920_s5 = smov 0   ;;  %s1922_s25 = smov 0  }
  0x15 LB: > { %2226 = sst [smem:[#allocation22_spill]] %s1809_s19  ;;  %s1447_s26 = sadd.s32 4294967295, %s1837_s25   ;;  %s1837_s25 = sphi %s1922_s25, %s33_s25   ;;  %s1833_s5 = sphi %s1920_s5, %s2256_s5   ;;  %s1829_s24 = sphi %s1918_s24, %s2250_s24   ;;  %s1825_s23 = sphi %s1916_s23, %s2255_s23   ;;  %s1821_s22 = sphi %s1914_s22, %s2249_s22   ;;  %s1817_s21 = sphi %s1912_s21, %s2254_s21   ;;  %s1813_s20 = sphi %s1910_s20, %s2253_s20   ;;  %s1809_s19 = sphi %s1908_s19, %s2252_s19  }
  0x16   : > { %2227 = sst [smem:[#allocation23_spill]] %s1829_s24  ;;  %p1449_p0 = scmp.ge.s32.totalorder %s1837_s25, 1 }
  0x17   : > { %p1950_p1 = scmp.eq.s32.totalorder %s1447_s26, 0  ;;  %p375_p2 = scmp.lt.s32.totalorder %s1837_s25, 5 }
  0x18   : > { %s2229_s2 = sld [smem:[#allocation29_spill]]  ;;  %s1839_s13 = smov [#allocation13]  }
  0x19   : > { %p1958_p3 = pnand %p1449_p0, %p375_p2  ;;  %s388_s14 = sshll.u32 %s1839_s13, 4  ;;  %s389_s14 = int_to_ptr.vmem [resolvable:$true] %s388_s14 }
  0x1a   : > { %s1840_s15 = smov 64   ;;  %s1841_s16 = smov 4  }
  0x1b   : > { %p1523_p4 = pneg %p1958_p3  ;;  %s1448_s17 = sadd.s32 4294967294, %s1837_s25  }
  0x1c   : > { %s48_s18 = sadd.s32 1, %s1829_s24  ;;  %s52_s28 = sadd.s32 1, %s1833_s5 }
  0x1d   : > { %p1524_p5 = pnand %p1523_p4, %p1950_p1  ;;  %p50_p6 = scmp.ge.s32.totalorder %s48_s18, 2 }
  0x1e   : > { %s386_s30 = sshll.u32 %s2229_s2, 4  ;;  %s91_s29 = sadd.s32 1, %s1817_s21  ;;  %s387_s30 = int_to_ptr.hbm [resolvable:$true] %s386_s30 }
  0x1f   : > { %1526 = dma.hbm_to_vmem [thread:$0]  (!%p1524_p5), %s387_s30, 256, %s389_s14, [#allocation14], %s1840_s15, %s1840_s15, %s1841_s16  }
  0x20   : > { %p98_p7 = scmp.ne.s32.totalorder %s1817_s21, %s1813_s20  ;;  %p99_p8 = scmp.eq.s32.totalorder %s1837_s25, 0 }
  0x21   : > { %s2258_s18 = smov (%p50_p6, %s48_s18), 0  ;;  %s2260_s28 = smov (!%p50_p6, %s52_s28), %s1833_s5 }
  0x22   : > { %2231 = sst [smem:[#allocation24_spill]] %s2258_s18  ;;  %p1976_p9 = por %p99_p8, %p98_p7 }
  0x23   : > { %p104_p10 = scmp.ne.s32.totalorder %s1813_s20, %s1809_s19  ;;  %p54_p11 = scmp.ge.s32.totalorder %s2260_s28, 2 }
  0x24   : > { %p304_p12 = scmp.eq.s32.totalorder %s1447_s26, 3  ;;  %p310_p0 = scmp.eq.s32.totalorder %s1448_s17, 3 }
  0x25   : > { %p1984_p13 = por %p1950_p1, %p104_p10  ;;  %s2262_s28 = smov (%p54_p11, %s2260_s28), 0 }
  0x26   : > { %2234 = sst [smem:[#allocation25_spill]] %s2262_s28  ;;  %p1990_p2 = por %p304_p12, %p98_p7 }
  0x27   : > { %p1994_p4 = por %p310_p0, %p104_p10  ;;  %s88_s16 = ssub.s32 %s1833_s5, %s2262_s28 }
  0x28   : > { %p1539_p5 = scmp.lt.s32.totalorder %s1837_s25, 4  ;;  %p89_p6 = scmp.eq.s32.totalorder %s88_s16, 0 }
  0x29   : > { %s2236_s15 = scalar_select %p1994_p4, 1, 0 }
  0x2a   : > { %s428_s26 = sand.u32 1, %s1817_s21   ;;  %s1453_s17 = sshll.u32 %s1833_s5, 3 }
  0x2b   : > { %2237 = sst [smem:[#allocation26_spill]] %s2236_s15  ;;  %s1452_s2 = sshll.u32 %s428_s26, 3 }
  0x2c   : > { %s2003_s18 = scalar_select %p89_p6, %s1817_s21, %s91_s29  }
  0x2d   : > { %s2238_s1 = sld [smem:[#allocation28_spill]]  ;;  %s432_s9 = scalar_lea.vmem [#allocation10], %s1452_s2 }
  0x2e   : > { %s440_s4 = sshll.u32 %s432_s9, 4  ;;  %p1528_p7 = pnand %p1539_p5, %p1976_p9  ;;  %s441_s4 = int_to_ptr.vmem [resolvable:$true] %s440_s4 }
  0x2f   : > { %s429_s15 = scalar_lea.sflag [#allocation11], %s428_s26  ;;  %s2014_s29 = sand.u32 (!%p1958_p3), 1, %s1813_s20  }
  0x30   : > { %s1455_s19 = sshll.u32 (!%p1958_p3), %s2014_s29, 3  ;;  %s452_s24 = scalar_lea.sflag (!%p1958_p3), [#allocation11], %s2014_s29 }
  0x31   : > { %449 = sbr.rel (%p1958_p3) target bundleno = 1310 (0x51e), region = 44  ;;  %s455_s2 = scalar_lea.vmem (!%p1958_p3), [#allocation10], %s1455_s19 }
  0x33   : > { %s436_s11 = scalar_lea.hbm %s2238_s1, %s1453_s17 }
  0x34   : > { %s438_s10 = sshll.u32 %s436_s11, 4  ;;  %s439_s10 = int_to_ptr.hbm [resolvable:$true] %s438_s10 }
  0x35   : > { %1530 = dma.hbm_to_vmem [thread:$0]  (!%p1528_p7), %s439_s10, 128, %s441_s4, %s429_s15  }
  0x36   : > { %1792 = dma.done.wait (%p1984_p13), %s452_s24, 128  }
  0x37   : > { %1794 = vsyncadd (%p1984_p13), %s452_s24, 4294967168 }
  0x38   : > { %1796 = dma.done.wait (%p1950_p1), [#allocation14], 256  }
  0x39   : > { %1798 = vsyncadd (%p1950_p1), [#allocation14], 4294967040  ;;  %s2026_s4 = sld [smem:[#allocation9]]  ;;  %p559_p3 = scmp.lt.s32.totalorder %s1825_s23, 1 }
  0x3a   : > { %p625_p8 = scmp.eq.s32.totalorder %s1821_s22, 0  ;;  %s2239_s0 = sld [smem:[#allocation27_spill]] }
  0x3b   : > { %s560_s9 = scalar_select %p559_p3, %s1825_s23, 1  ;;  %vm652_vm0 = vcmask (%p625_p8), 261120   ;;  %v631_v2 = vld [vmem:[%s455_s2] sm:$0xff] (%p625_p8)  ;;  %v1508_v6 = vld [vmem:[#allocation13 + $0x8] sm:$0xff] (%p625_p8)  ;;  %v1507_v7 = vld [vmem:[#allocation13] sm:$0xff] (%p625_p8)  ;;  %vm751_vm1 = vcmask (%p625_p8), 57344  }
  0x3c   : > { %s2240_s6 = sld [smem:[#allocation32_spill]]  ;;  %s555_s28 = scalar_lea.vmem [#allocation16], %s2014_s29  ;;  %1477 = vmatpush.xpose.msk.msra.mxu1 (%p625_p8), %vm652_vm0, %v631_v2  ;;  %662 = vmatpush.bf16.msra.mxu0 (%p625_p8), %v1508_v6  ;;  %v632_v8 = vpack.c.bf16 (%p625_p8), %v631_v2, %v631_v2  ;;  %v1842_v15 = vmov (%p625_p8), 0.0   ;;  %vm671_vm2 = vcmask (%p625_p8), 257024   ;;  %v1843_v20 = vmov (%p625_p8), -inf  }
  0x3d   : > { %s1501_s10 = sshll.u32 %s560_s9, 4  ;;  %s2241_s3 = sld [smem:[#allocation30_spill]]  ;;  %757 = vst.msk [vmem:[#allocation7] sm:$0x1] (%p625_p8), %vm751_vm1, %v1842_v15 }
  0x3e   : > { %s2049_s24 = scalar_lea.vmem %s2204_s7, %s1501_s10  ;;  %s2054_s11 = scalar_lea.vmem %s2205_s8, %s1501_s10  ;;  %756 = vst.msk [vmem:[#allocation6] sm:$0x1] (%p625_p8), %vm751_vm1, %v1843_v20 }
  0x3f   : > { %s2242_s30 = sld [smem:[#allocation34_spill]]  ;;  %v677_v16 = vstv (%p625_p8), %s2026_s4 }
  0x40   : > { %s2034_s13 = scalar_lea.vmem %s2239_s0, %s1501_s10  ;;  %663 = vmatpush.bf16.msra.mxu0 (%p625_p8), %v1507_v7 }
  0x41   : > { %630 = sbr.rel (!%p625_p8) target bundleno = 397 (0x18d), region = 56 }
  0x42   : > { %s2039_s27 = scalar_lea.vmem %s2240_s6, %s1501_s10  ;;  %s536_s6 = scalar_lea.vmem [#allocation15], %s2014_s29 }
  0x43   : > { %v2044_v0 = vld [vmem:[%s2241_s3] sm:$0x1]  ;;  %s2243_s3 = sld [smem:[#allocation31_spill]] (%p625_p8)  ;;  %1476 = vmatmul.msk.bf16.vlgmr.msra.gmra.mxu0 (%p625_p8), %vm652_vm0, %v632_v8 }
  0x44   : > { %v638_v11 = vperm.slane (%p625_p8), %v2044_v0, 0 }
  0x45   : > { %s2059_s15 = scalar_lea.vmem %s2242_s30, %s1501_s10 }
  0x49   : > { %v673_v1 = vld [vmem:[%s2243_s3] sm:$0xff]  ;;  %v674_v3 = vld [vmem:[%s2243_s3 + $0x8] sm:$0xff]  ;;  %v675_v4 = vld [vmem:[%s2243_s3 + $0x10] sm:$0xff] }
  0x4a   : > { %678 = vxpose.xlu0.b32.start [1/4] (short) (narrow) %v673_v1, 8  ;;  %v676_v5 = vld [vmem:[%s2243_s3 + $0x18] sm:$0xff] }
  0x52   : > { %679 = vxpose.xlu0.b32.cont [2/4] (short) (narrow) %v674_v3, 8 }
  0x5a   : > { %680 = vxpose.xlu0.b32.cont [3/4] (short) (narrow) %v675_v4, 8 }
  0x62   : > { %681 = vxpose.xlu0.b32.end [4/4] (short) (narrow) %v676_v5, 8 }
  0xc0   : > { %v665_v10 = vpop.f32.mrf.mxu0 }
  0xc1   : > { %v666_v13 = vadd.f32 %v665_v10, %v638_v11 }
  0xc3   : > { %v669_v14 = vmul.f32 0.4204482, %v666_v13 }
  0xc5   : > { %v670_v17 = vpack.c.bf16 %v669_v14, %v669_v14 }
  0xc7   : > { %672 = vst.msk [vmem:[#allocation2] sm:$0xf] %vm671_vm2, %v670_v17 }
  0xc8   : > { %v667_v12 = vpop.f32.mrf.mxu0 }
  0xee   : > { %v694_v9 = vpop.trf.xlu0 }
  0xef   : > { %1478 = vmatmul.msk.f32.vlgmr.msra.gmra.mxu1 %vm652_vm0, %v694_v9 }
 0x16c   : > { %v733_v18 = vpop.f32.mrf.mxu1 }
 0x16d   : > { %v734_v19 = vadd.f32 %v733_v18, %v677_v16 }
 0x16f   : > { %v737_v21 = vand.u32 2147483647, %v734_v19  ;;  %v736_v32 = vmin.f32 %v734_v19, 0.0 }
 0x171   : > { %v738_v22 = vsub.f32 0.0, %v737_v21 }
 0x173   : > { %v739_v23 = vmul.f32 1.442695, %v738_v22 }
 0x175   : > { %1612 = vpow2.f32 %v739_v23 }
 0x17b   : > { %v1613_v24 = vpop.eup %1612 }
 0x17c   : > { %v741_v25 = vadd.f32 1.0, %v1613_v24  ;;  %v744_v26 = vmul.f32 -0.5, %v1613_v24  ;;  %v747_v28 = vand.u32 2147483647, %v1613_v24 }
 0x17e   : > { %1614 = vlog2.f32 %v741_v25  ;;  %v745_v27 = vadd.f32 1.0, %v744_v26  ;;  %vm748_vm3 = vcmp.lt.f32.partialorder %v747_v28, 0.0004427343 }
 0x180   : > { %v746_v31 = vmul.f32 %v1613_v24, %v745_v27 }
 0x184   : > { %v1615_v29 = vpop.eup %1614 }
 0x185   : > { %v743_v30 = vmul.f32 0.6931472, %v1615_v29 }
 0x187   : > { %v749_v33 = vsel %vm748_vm3, %v746_v31, %v743_v30 }
 0x188   : > { %v750_v34 = vsub.f32 %v736_v32, %v749_v33 }
 0x18a   : > { %752 = vst.msk [vmem:[#allocation5] sm:$0x1] %vm751_vm1, %v750_v34  ;;  %v754_v35 = vsub.f32 %v750_v34, %v734_v19 }
 0x18b   : > { %753 = vst.msk [vmem:[%s536_s6] sm:$0x1] %vm751_vm1, %v750_v34 }
 0x18c   : > { %755 = vst.msk [vmem:[%s555_s28] sm:$0x1] %vm751_vm1, %v754_v35 }
 0x18d PF: > { %p1479_p1 = scmp.ne.s32.totalorder %s1821_s22, 0 }
 0x18e   : > { %s2244_s12 = sld [smem:[#allocation31_spill]] (!%p1479_p1) }
 0x18f   : > { %760 = sbr.rel (%p1479_p1) target bundleno = 745 (0x2e9), region = 60 }
 0x194   : > { %v1510_v36 = vld [vmem:[#allocation13 + $0x8] sm:$0xff]  ;;  %v1509_v37 = vld [vmem:[#allocation13] sm:$0xff]  ;;  %v761_v38 = vld [vmem:[%s2034_s13] sm:$0xff]  ;;  %vm783_vm4 = vcmask 261120   ;;  %v769_v47 = vperm.slane %v2044_v0, 0  ;;  %vm808_vm5 = vcmask 257024   ;;  %v815_v59 = vstv %s2026_s4 }
 0x195   : > { %793 = vmatpush.bf16.msra.mxu0 %v1510_v36  ;;  %v762_v39 = vld [vmem:[%s2034_s13 + $0x8] sm:$0xff]  ;;  %v814_v41 = vld [vmem:[%s2244_s12 + $0x18] sm:$0xff]  ;;  %v813_v42 = vld [vmem:[%s2244_s12 + $0x10] sm:$0xff]  ;;  %vm877_vm7 = vcmask 7168   ;;  %vm912_vm9 = vcmask 64512   ;;  %vm948_vm10 = vcmask 57344  }
 0x196   : > { %v763_v40 = vpack.c.bf16 %v762_v39, %v761_v38  ;;  %834 = vmatpush.msra.mxu1 %v814_v41  ;;  %v812_v43 = vld [vmem:[%s2244_s12 + $0x8] sm:$0xff]  ;;  %v886_v44 = vld [vmem:[#allocation2] sm:$0xf] }
 0x197   : > { %v896_v45 = vsel %vm783_vm4, %v886_v44, 0  ;;  %v811_v46 = vld [vmem:[%s2244_s12] sm:$0xff] }
 0x198   : > { %835 = vmatpush.msra.mxu1 %v813_v42  ;;  %905 = vmatpush.bf16.xpose.msra.mxu2 %v896_v45 }
 0x199   : > { %794 = vmatpush.bf16.msra.mxu0 %v1509_v37 }
 0x19a   : > { %836 = vmatpush.msra.mxu1 %v812_v43 }
 0x19c   : > { %1488 = vmatmul.msk.bf16.vlgmr.msra.gmra.mxu0 %vm783_vm4, %v763_v40  ;;  %837 = vmatpush.msra.mxu1 %v811_v46  ;;  %v922_v40 = vld [vmem:[#allocation6] sm:$0x1] }
 0x19d   : > { %1489 = vmatmul.msk.f32.vlgmr.msra.gmra.mxu1 %vm783_vm4, %v761_v38 }
 0x1a5   : > { %1490 = vmatmul.msk.f32.gmra.mxu1 %vm783_vm4, %v762_v39 }
 0x219   : > { %v796_v48 = vpop.f32.mrf.mxu0 }
 0x21a   : > { %v797_v49 = vadd.f32 %v796_v48, %v769_v47  ;;  %v839_v60 = vpop.f32.mrf.mxu1 }
 0x21b   : > { %v840_v61 = vadd.f32 %v839_v60, %v815_v59  ;;  %v924_v60 = vld [vmem:[#allocation7] sm:$0x1] }
 0x21c   : > { %v801_v50 = vmul.f32 0.4204482, %v797_v49 }
 0x21d   : > { %v847_v62 = vand.u32 2147483647, %v840_v61  ;;  %v845_v14 = vmin.f32 %v840_v61, 0.0 }
 0x21e   : > { %v803_v51 = vpack.c.bf16 %v801_v50, %v801_v50 }
 0x21f   : > { %v849_v63 = vsub.f32 0.0, %v847_v62 }
 0x220   : > { %809 = vst.msk [vmem:[#allocation3] sm:$0xf] %vm808_vm5, %v803_v51  ;;  %v889_v56 = vunpack.c.l.b16 %v803_v51 }
 0x221   : > { %v798_v52 = vpop.f32.mrf.mxu0  ;;  %v851_v0 = vmul.f32 1.442695, %v849_v63 }
 0x222   : > { %v799_v53 = vadd.f32 %v798_v52, %v769_v47  ;;  %v842_v1 = vpop.f32.mrf.mxu1 }
 0x223   : > { %1616 = vpow2.f32 %v851_v0  ;;  %v843_v2 = vadd.f32 %v842_v1, %v815_v59 }
 0x224   : > { %v802_v54 = vmul.f32 0.4204482, %v799_v53 }
 0x225   : > { %v848_v3 = vand.u32 2147483647, %v843_v2  ;;  %v846_v25 = vmin.f32 %v843_v2, 0.0 }
 0x226   : > { %v804_v55 = vpack.c.bf16 %v802_v54, %v802_v54 }
 0x227   : > { %v850_v4 = vsub.f32 0.0, %v848_v3 }
 0x228   : > { %810 = vst.msk [vmem:[#allocation3 + $0x4] sm:$0xf] %vm808_vm5, %v804_v55  ;;  %v890_v57 = vunpack.c.l.b16 %v804_v55 }
 0x229   : > { %v1617_v5 = vpop.eup %1616  ;;  %v853_v6 = vmul.f32 1.442695, %v850_v4 }
 0x22a   : > { %v891_v58 = vpack.c.b16 %v890_v57, %v889_v56  ;;  %v855_v7 = vadd.f32 1.0, %v1617_v5  ;;  %v858_v8 = vmul.f32 -0.5, %v1617_v5  ;;  %v861_v10 = vand.u32 2147483647, %v1617_v5 }
 0x22b   : > { %1618 = vpow2.f32 %v853_v6 }
 0x22c   : > { %1491 = vmatmul.msk.bf16.vlgmr.msra.gmra.mxu2 %vm783_vm4, %v891_v58  ;;  %1620 = vlog2.f32 %v855_v7  ;;  %v859_v9 = vadd.f32 1.0, %v858_v8  ;;  %vm862_vm6 = vcmp.lt.f32.partialorder %v861_v10, 0.0004427343 }
 0x22e   : > { %v860_v12 = vmul.f32 %v1617_v5, %v859_v9 }
 0x231   : > { %v1619_v11 = vpop.eup %1618 }
 0x232   : > { %v1621_v13 = vpop.eup %1620  ;;  %v864_v15 = vadd.f32 1.0, %v1619_v11  ;;  %v867_v16 = vmul.f32 -0.5, %v1619_v11  ;;  %v870_v21 = vand.u32 2147483647, %v1619_v11 }
 0x233   : > { %v857_v17 = vmul.f32 0.6931472, %v1621_v13 }
 0x234   : > { %1622 = vlog2.f32 %v864_v15  ;;  %v868_v19 = vadd.f32 1.0, %v867_v16  ;;  %vm871_vm8 = vcmp.lt.f32.partialorder %v870_v21, 0.0004427343 }
 0x235   : > { %v863_v18 = vsel %vm862_vm6, %v860_v12, %v857_v17 }
 0x236   : > { %v873_v20 = vsub.f32 %v845_v14, %v863_v18  ;;  %v869_v23 = vmul.f32 %v1619_v11, %v868_v19 }
 0x238   : > { %878 = vst.msk [vmem:[#allocation4] sm:$0xff] %vm877_vm7, %v873_v20  ;;  %v882_v22 = vsub.f32 %v873_v20, %v840_v61 }
 0x239   : > { %880 = vst.msk [vmem:[%s2054_s11] sm:$0xff] %vm877_vm7, %v873_v20 }
 0x23a   : > { %v1623_v24 = vpop.eup %1622  ;;  %884 = vst.msk [vmem:[%s2059_s15] sm:$0xff] %vm877_vm7, %v882_v22 }
 0x23b   : > { %v866_v26 = vmul.f32 0.6931472, %v1623_v24 }
 0x23d   : > { %v872_v27 = vsel %vm871_vm8, %v869_v23, %v866_v26 }
 0x23e   : > { %v874_v28 = vsub.f32 %v846_v25, %v872_v27 }
 0x240   : > { %879 = vst.msk [vmem:[#allocation4 + $0x8] sm:$0xff] %vm877_vm7, %v874_v28  ;;  %v883_v29 = vsub.f32 %v874_v28, %v843_v2 }
 0x241   : > { %881 = vst.msk [vmem:[%s2054_s11 + $0x8] sm:$0xff] %vm877_vm7, %v874_v28 }
 0x242   : > { %885 = vst.msk [vmem:[%s2059_s15 + $0x8] sm:$0xff] %vm877_vm7, %v883_v29 }
 0x2af   : > { %v907_v30 = vpop.f32.mrf.mxu2 }
 0x2b0   : > { %v913_v32 = vsel %vm912_vm9, %v907_v30, -inf }
 0x2b7   : > { %v909_v31 = vpop.f32.mrf.mxu2 }
 0x2b8   : > { %v914_v33 = vsel %vm912_vm9, %v909_v31, -inf }
 0x2b9   : > { %v915_v34 = vmax.f32 %v913_v32, %v914_v33 }
 0x2bb   : > { %v916_v35 = vrot.slane %v915_v34, 4 }
 0x2bd   : > { %v917_v36 = vmax.f32 %v915_v34, %v916_v35 }
 0x2bf   : > { %v918_v37 = vrot.slane %v917_v36, 2 }
 0x2c1   : > { %v919_v38 = vmax.f32 %v917_v36, %v918_v37 }
 0x2c3   : > { %v920_v39 = vrot.slane %v919_v38, 1 }
 0x2c5   : > { %v921_v41 = vmax.f32 %v919_v38, %v920_v39 }
 0x2c7   : > { %v923_v42 = vmax.f32 %v922_v40, %v921_v41 }
 0x2c9   : > { %v930_v43 = vperm.slane %v923_v42, 0  ;;  %950 = vst.msk [vmem:[#allocation6] sm:$0x1] %vm948_vm10, %v923_v42  ;;  %v925_v48 = vsub.f32 %v922_v40, %v923_v42 }
 0x2cb   : > { %v932_v44 = vsub.f32 %v907_v30, %v930_v43  ;;  %v933_v45 = vsub.f32 %v909_v31, %v930_v43  ;;  %v926_v52 = vmul.f32 1.442695, %v925_v48 }
 0x2cd   : > { %v934_v46 = vmul.f32 1.442695, %v932_v44  ;;  %v936_v47 = vmul.f32 1.442695, %v933_v45 }
 0x2cf   : > { %1624 = vpow2.f32 %v934_v46 }
 0x2d0   : > { %1626 = vpow2.f32 %v936_v47 }
 0x2d1   : > { %1628 = vpow2.f32 %v926_v52 }
 0x2d5   : > { %v1625_v49 = vpop.eup %1624 }
 0x2d6   : > { %v1627_v50 = vpop.eup %1626  ;;  %v938_v51 = vsel %vm912_vm9, %v1625_v49, 0.0 }
 0x2d7   : > { %v939_v53 = vsel %vm912_vm9, %v1627_v50, 0.0  ;;  %v1629_v59 = vpop.eup %1628 }
 0x2d8   : > { %v940_v54 = vadd.f32 %v939_v53, %v938_v51  ;;  %v928_v62 = vmul.f32 %v1629_v59, %v924_v60 }
 0x2da   : > { %v941_v55 = vrot.slane %v940_v54, 4 }
 0x2dc   : > { %v942_v56 = vadd.f32 %v941_v55, %v940_v54 }
 0x2de   : > { %v943_v57 = vrot.slane %v942_v56, 2 }
 0x2e0   : > { %v944_v58 = vadd.f32 %v943_v57, %v942_v56 }
 0x2e2   : > { %v945_v61 = vrot.slane %v944_v58, 1 }
 0x2e4   : > { %v946_v63 = vadd.f32 %v945_v61, %v944_v58 }
 0x2e6   : > { %v947_v0 = vadd.f32 %v946_v63, %v928_v62 }
 0x2e8   : > { %949 = vst.msk [vmem:[#allocation7] sm:$0x1] %vm948_vm10, %v947_v0 }
 0x2e9 PF: > { %p951_p9 = scmp.eq.s32.totalorder %s1821_s22, 1 }
 0x2ea   : > { %v957_v3 = vld [vmem:[#allocation6] sm:$0x1] (%p951_p9)  ;;  %v956_v5 = vld [vmem:[#allocation5] sm:$0x1] (%p951_p9)  ;;  %vm963_vm11 = vcmask (%p951_p9), 57344  }
 0x2eb   : > { %955 = sbr.rel (!%p951_p9) target bundleno = 766 (0x2fe), region = 64 }
 0x2ef   : > { %v958_v1 = vld [vmem:[#allocation7] sm:$0x1] (%p951_p9) }
 0x2f0   : > { %1630 = vlog2.f32 %v958_v1 }
 0x2f6   : > { %v1631_v2 = vpop.eup %1630 }
 0x2f7   : > { %v960_v4 = vmul.f32 0.6931472, %v1631_v2 }
 0x2f9   : > { %v961_v6 = vadd.f32 %v960_v4, %v957_v3 }
 0x2fb   : > { %v962_v7 = vsub.f32 %v956_v5, %v961_v6 }
 0x2fd   : > { %964 = vst.msk [vmem:[#allocation8] sm:$0x1] %vm963_vm11, %v962_v7 }
 0x2fe PF: > { %p1493_p10 = scmp.ne.s32.totalorder %s1821_s22, 1 }
 0x300   : > { %967 = sbr.rel (%p1493_p10) target bundleno = 1270 (0x4f6), region = 68 }
 0x305   : > { %v973_v8 = vld [vmem:[#allocation2] sm:$0xf]  ;;  %vm979_vm12 = vcmask 261120   ;;  %v1512_v10 = vld [vmem:[#allocation3] sm:$0xff]  ;;  %vm1000_vm13 = vcmask 64512   ;;  %v1844_v25 = vmov 0  }
 0x306   : > { %v984_v9 = vsel %vm979_vm12, %v973_v8, 0  ;;  %1632 = vset.pattern.permute.xlu2 %v1844_v25  ;;  %1633 = vset.pattern.permute.xlu0 %v1844_v25  ;;  %v1031_v30 = vld [vmem:[#allocation4] sm:$0xff]  ;;  %v1032_v35 = vld [vmem:[#allocation4 + $0x8] sm:$0xff]  ;;  %v1634_v39 = vld [vmem:[#allocation8] ss:$0 sm:$0xff] }
 0x307   : > { %993 = vmatpush.bf16.xpose.msra.mxu0 %v984_v9 }
 0x30e   : > { %1498 = vmatmul.msk.bf16.vlgmr.msra.gmra.mxu0 %vm979_vm12, %v1512_v10 }
 0x38b   : > { %v995_v11 = vpop.f32.mrf.mxu0 }
 0x38c   : > { %1001 = vst.msk [vmem:[%s2039_s27] sm:$0xff] %vm1000_vm13, %v995_v11  ;;  %v1003_v12 = vsel %vm1000_vm13, %v995_v11, -inf  ;;  %v1027_v38 = vadd.f32 %v995_v11, %v995_v11 }
 0x38d   : > { %1004 = vmax.xlane.f32.xlu0 %v1003_v12 }
 0x393   : > { %v997_v13 = vpop.f32.mrf.mxu0 }
 0x394   : > { %1002 = vst.msk [vmem:[%s2039_s27 + $0x8] sm:$0xff] %vm1000_vm13, %v997_v13  ;;  %v1006_v14 = vsel %vm1000_vm13, %v997_v13, -inf  ;;  %v1028_v43 = vadd.f32 %v997_v13, %v997_v13 }
 0x395   : > { %1007 = vmax.xlane.f32.xlu0 %v1006_v14 }
 0x400   : > { %v1005_v15 = vpop.xlane.xlu0 %1004 }
 0x401   : > { %v1009_v16 = vsub.f32 %v995_v11, %v1005_v15 }
 0x403   : > { %v1011_v17 = vmul.f32 1.442695, %v1009_v16 }
 0x405   : > { %1635 = vpow2.f32 %v1011_v17 }
 0x408   : > { %v1008_v18 = vpop.xlane.xlu0 %1007 }
 0x409   : > { %v1010_v19 = vsub.f32 %v997_v13, %v1008_v18 }
 0x40b   : > { %v1636_v20 = vpop.eup %1635  ;;  %v1013_v21 = vmul.f32 1.442695, %v1010_v19 }
 0x40c   : > { %v1015_v22 = vsel %vm1000_vm13, %v1636_v20, 0.0 }
 0x40d   : > { %1637 = vpow2.f32 %v1013_v21  ;;  %1016 = vadd.xlane.f32.xlu1 %v1015_v22 }
 0x413   : > { %v1638_v23 = vpop.eup %1637 }
 0x414   : > { %v1018_v24 = vsel %vm1000_vm13, %v1638_v23, 0.0 }
 0x415   : > { %1019 = vadd.xlane.f32.xlu1 %v1018_v24 }
 0x480   : > { %v1017_v26 = vpop.xlane.xlu1 %1016 }
 0x481   : > { %1639 = vlog2.f32 %v1017_v26 }
 0x487   : > { %v1640_v27 = vpop.eup %1639 }
 0x488   : > { %v1022_v28 = vmul.f32 0.6931472, %v1640_v27  ;;  %v1020_v29 = vpop.xlane.xlu1 %1019 }
 0x489   : > { %1641 = vlog2.f32 %v1020_v29 }
 0x48a   : > { %v1025_v31 = vadd.f32 %v1022_v28, %v1005_v15 }
 0x48c   : > { %v1033_v32 = vsub.f32 %v1031_v30, %v1025_v31 }
 0x48e   : > { %1037 = vperm.xlu2 %1632, %v1033_v32  }
 0x48f   : > { %v1642_v33 = vpop.eup %1641 }
 0x490   : > { %v1024_v34 = vmul.f32 0.6931472, %v1642_v33 }
 0x492   : > { %v1026_v36 = vadd.f32 %v1024_v34, %v1008_v18 }
 0x494   : > { %v1034_v37 = vsub.f32 %v1032_v35, %v1026_v36 }
 0x496   : > { %1042 = vperm.xlu2 %1632, %v1034_v37  }
 0x4e8   : > { %v1038_v40 = vpop.permute.xlu2 %1037 }
 0x4e9   : > { %v1045_v41 = vadd.f32 %v1038_v40, %v1027_v38 }
 0x4eb   : > { %v1051_v42 = vadd.f32 %v1634_v39, %v1045_v41 }
 0x4ed   : > { %1053 = vst.msk [vmem:[%s2049_s24] sm:$0xff] %vm1000_vm13, %v1051_v42 }
 0x4f0   : > { %v1043_v44 = vpop.permute.xlu2 %1042 }
 0x4f1   : > { %v1046_v45 = vadd.f32 %v1043_v44, %v1028_v43 }
 0x4f3   : > { %v1052_v46 = vadd.f32 %v1634_v39, %v1046_v45 }
 0x4f5   : > { %1054 = vst.msk [vmem:[%s2049_s24 + $0x8] sm:$0xff] %vm1000_vm13, %v1052_v46 }
 0x4f6 PF: > { %s2245_s27 = sld [smem:[#allocation33_spill]]  ;;  %s1128_s15 = sshll.u32 %s536_s6, 4  ;;  %s1129_s15 = int_to_ptr.vmem [resolvable:$true] %s1128_s15 }
 0x4f7   : > { %s1087_s10 = scalar_lea.sflag [#allocation12], %s2014_s29 }
 0x4fc   : > { %s1126_s11 = scalar_lea.hbm %s2245_s27, %s1825_s23  ;;  %s1723_s2 = scalar_lea.hbm %s2245_s27, 2 }
 0x4fd   : > { %s1130_s0 = sshll.u32 %s1126_s11, 4  ;;  %s1131_s0 = int_to_ptr.hbm [resolvable:$true] %s1130_s0 }
 0x4fe   : > { %s1717_s19 = sshra.s32 %s1131_s0, 4  ;;  %s1718_s19 = int_to_ptr.hbm [resolvable:$true] %s1717_s19 }
 0x4ff   : > { %s1719_s9 = scalar_lea.hbm %s1718_s19, 1  ;;  %p1724_p0 = scmp.lt.s32.totalorder %s1718_s19, %s2245_s27 }
 0x500   : > { %p1720_p11 = scmp.ne.s32.totalorder %s1718_s19, %s1719_s9  ;;  %p1725_p5 = scmp.lt.s32.totalorder %s1723_s2, %s1719_s9 }
 0x502   : > { %p1721_p12 = pnand %p1720_p11, %p1990_p2  ;;  %p1726_p6 = por %p1725_p5, %p1724_p0 }
 0x504   : > { %p1722_p13 = pneg %p1721_p12 }
 0x506   : > { %p1727_p7 = pnand %p1726_p6, %p1722_p13 }
 0x508   : > { %1730 = shalt.err (!%p1727_p7)
}
 0x509   : > { %1519 = dma.vmem_to_hbm [thread:$0]  (%p1990_p2), %s1129_s15, 16, %s1131_s0, %s1087_s10  }
 0x50a   : > { %s2246_s26 = sld [smem:[#allocation35_spill]]  ;;  %s1147_s13 = sshll.u32 %s555_s28, 4  ;;  %s1148_s13 = int_to_ptr.vmem [resolvable:$true] %s1147_s13 }
 0x50b   : > { %s1102_s22 = scalar_lea.sflag [#allocation17], %s2014_s29 }
 0x510   : > { %s1145_s1 = scalar_lea.hbm %s2246_s26, %s1825_s23  ;;  %s1751_s15 = scalar_lea.hbm %s2246_s26, 2 }
 0x511   : > { %s1149_s17 = sshll.u32 %s1145_s1, 4  ;;  %s1150_s17 = int_to_ptr.hbm [resolvable:$true] %s1149_s17 }
 0x512   : > { %s1745_s4 = sshra.s32 %s1150_s17, 4  ;;  %s1746_s4 = int_to_ptr.hbm [resolvable:$true] %s1745_s4 }
 0x513   : > { %s1747_s11 = scalar_lea.hbm %s1746_s4, 1  ;;  %p1752_p9 = scmp.lt.s32.totalorder %s1746_s4, %s2246_s26 }
 0x514   : > { %p1748_p3 = scmp.ne.s32.totalorder %s1746_s4, %s1747_s11  ;;  %p1753_p10 = scmp.lt.s32.totalorder %s1751_s15, %s1747_s11 }
 0x516   : > { %p1749_p8 = pnand %p1748_p3, %p1990_p2  ;;  %p1754_p11 = por %p1753_p10, %p1752_p9 }
 0x518   : > { %p1750_p1 = pneg %p1749_p8 }
 0x51a   : > { %p1755_p12 = pnand %p1754_p11, %p1750_p1 }
 0x51c   : > { %1758 = shalt.err (!%p1755_p12)
}
 0x51d   : > { %1520 = dma.vmem_to_hbm [thread:$0]  (%p1990_p2), %s1148_s13, 16, %s1150_s17, %s1102_s22  }
 0x51e PF: > { %s2247_s23 = sld [smem:[#allocation22_spill]]  ;;  %p1541_p13 = scmp.ge.s32.totalorder %s1837_s25, 2 }
 0x520   : > { %p1532_p0 = pnand %p1541_p13, %p1994_p4 }
 0x522   : > { %p1533_p5 = pneg %p1532_p0 }
 0x524   : > { %s1201_s29 = sand.u32 1, %s2247_s23  }
 0x525   : > { %s1202_s24 = scalar_lea.sflag [#allocation12], %s1201_s29 }
 0x526   : > { %1800 = dma.done.wait (%p1533_p5), %s1202_s24, 16  }
 0x527   : > { %1802 = vsyncadd (%p1533_p5), %s1202_s24, 4294967280  ;;  %s1225_s3 = scalar_lea.sflag [#allocation17], %s1201_s29 }
 0x528   : > { %1804 = dma.done.wait (%p1533_p5), %s1225_s3, 16  }
 0x529   : > { %1806 = vsyncadd (%p1533_p5), %s1225_s3, 4294967280  ;;  %s33_s25 = sadd.s32 1, %s1837_s25   ;;  %s2249_s22 = sld [smem:[#allocation23_spill]] }
 0x52a   : > { %p30_p6 = scmp.ge.s32.totalorder %s33_s25, 6   ;;  %s2250_s24 = sld [smem:[#allocation24_spill]] }
 0x52b   : > { %s2251_s14 = sld [smem:[#allocation25_spill]]  ;;  %s2252_s19 = smov %s1813_s20 }
 0x52c   : > { %s2253_s20 = smov %s1817_s21  ;;  %s2254_s21 = smov %s2003_s18 }
 0x52d   : > { %s2255_s23 = smov %s1833_s5  ;;  %32 = sbr.rel (!%p30_p6) target bundleno = 21 (0x15), region = 181 }
 0x531   : > { %s2256_s5 = smov %s2251_s14 }
 0x532   :  { %1230 = vsyncpa [#allocation11], 1 }
 0x533   :  { %1232 = vsyncpa [#allocation11 + $0x1], 1 }
 0x534   :  { %1233 = vsyncpa [#allocation14], 1 }
 0x535   :  { %1234 = vsyncpa [#allocation12], 1 }
 0x536   :  { %1236 = vsyncpa [#allocation12 + $0x1], 1 }
 0x537   :  { %1237 = vsyncpa [#allocation17], 1 }
 0x538   :  { %1239 = vsyncpa [#allocation17 + $0x1], 1 }

</bundles_post_ra>
